<compile_context>
chip_gen: v7x
topology: tpu7x:2x2x1
jax: 0.10.0
libtpu: 0.0.40
codegen_flags: <defaults>
</compile_context>

<pallas_src>
import math

import jax
import jax.numpy as jnp
from jax.experimental import pallas as pl
from jax.experimental.pallas import tpu as pltpu


def make_positional_encoding(max_len: int, d_model: int) -> jnp.ndarray:
    """Replicates PositionalEncoding.__init__ buffer exactly (even d_model, as in the original)."""
    position = jnp.arange(max_len, dtype=jnp.float32)[:, None]                   # [max_len, 1]
    div_term = jnp.exp(
        jnp.arange(0, d_model, 2, dtype=jnp.float32) * (-math.log(10000.0) / d_model)
    )                                                                            # [d_model/2]
    pe = jnp.zeros((max_len, d_model), dtype=jnp.float32)
    pe = pe.at[:, 0::2].set(jnp.sin(position * div_term))
    pe = pe.at[:, 1::2].set(jnp.cos(position * div_term))
    return pe


def positional_encoding_forward(x, pe):
    """x: [B, seq_len] (only seq_len matters; values are ignored). Returns pe[:seq_len, :]."""
    _, S = x.shape
    max_len, D = pe.shape
    assert S <= max_len, "seq_len must not exceed max_len"

    nbytes = S * D * pe.dtype.itemsize  # read once + written once

    def _dma_copy_kernel(pe_hbm, out_hbm, sem):
        # Single contiguous-prefix DMA, HBM -> HBM.  Pure bandwidth; TensorCore idle.
        cp = pltpu.make_async_copy(pe_hbm.at[pl.ds(0, S)], out_hbm, sem)
        cp.start()
        cp.wait()

    out = pl.pallas_call(
        _dma_copy_kernel,
        out_shape=jax.ShapeDtypeStruct((S, D), pe.dtype),
        in_specs=[pl.BlockSpec(memory_space=pl.ANY)],   # raw HBM ref, no auto-DMA / no VMEM round trip
        out_specs=pl.BlockSpec(memory_space=pl.ANY),    # output stays in HBM; we DMA straight into it
        scratch_shapes=[pltpu.SemaphoreType.DMA],
        cost_estimate=pl.CostEstimate(
            flops=0, transcendentals=0, bytes_accessed=2 * nbytes
        ),
    )(pe)
    return out


if __name__ == "__main__":
    # Module hyperparameters and small example shapes consistent with the forward.
    max_len, d_model = 16, 32
    B, S = 2, 8

    key = jax.random.PRNGKey(0)
    pe = make_positional_encoding(max_len, d_model)
    x = jax.random.randint(key, (B, S), 0, 50, dtype=jnp.int32)  # values unused by forward

    out = positional_encoding_forward(x, pe)
    out = jax.block_until_ready(out)

    # Pure-JAX reference: forward(x) == pe[:seq_len, :]
    ref = pe[:S, :]
    assert out.shape == (S, d_model)
    assert jnp.array_equal(out, ref), "mismatch vs reference"

    print("KERNEL_OK")
</pallas_src>

<mosaic_0001>
module attributes {stable_mosaic.version = 11 : i64} {
  func.func @_dma_copy_kernel(%arg0: memref<16x32xf32, #tpu.memory_space<any>>, %arg1: memref<8x32xf32, #tpu.memory_space<any>>, %arg2: memref<!tpu.dma_semaphore, #tpu.memory_space<semaphore_mem>>) attributes {dimension_semantics = [], scalar_prefetch = 0 : i64, scratch_operands = 1 : i64, tpu.core_type = #tpu.core_type<tc>} {
    %c0_i32 = arith.constant 0 : i32
    %c0_i32_0 = arith.constant 0 : i32
    %0 = tpu.memref_slice %arg0[%c0_i32, %c0_i32_0] : memref<16x32xf32, #tpu.memory_space<any>> -> memref<8x32xf32, #tpu.memory_space<any>>
    tpu.enqueue_dma source(%0 : memref<8x32xf32, #tpu.memory_space<any>>) target(%arg1 : memref<8x32xf32, #tpu.memory_space<any>>) target_semaphore(%arg2 : memref<!tpu.dma_semaphore, #tpu.memory_space<semaphore_mem>>)
    %c0_i32_1 = arith.constant 0 : i32
    %c0_i32_2 = arith.constant 0 : i32
    %1 = tpu.memref_slice %arg0[%c0_i32_1, %c0_i32_2] : memref<16x32xf32, #tpu.memory_space<any>> -> memref<8x32xf32, #tpu.memory_space<any>>
    tpu.wait_dma2 semaphore(%arg2 : memref<!tpu.dma_semaphore, #tpu.memory_space<semaphore_mem>>) src(%1 : memref<8x32xf32, #tpu.memory_space<any>>) dst(%arg1 : memref<8x32xf32, #tpu.memory_space<any>>)
    return
  }
}

</mosaic_0001>

<bundles_post_ra>
// kernel: tpu_custom_call.1
= control target key start
LH: loop header
LB: loop body
LE: loop exit
PB: predicated region body
PF: predicated region fallthrough
CT: control target
= control target key end

     0   :  { %s34_s6 = smov [#allocation2]   ;;  %s35_s7 = smov [#allocation3]   ;;  %s53_s0 = inlined_call_operand.hbm [shape: f32[16,32], index: 0, kind: input, shape index: {}]   ;;  %s54_s1 = inlined_call_operand.hbm [shape: f32[8,32], index: 1, kind: output, shape index: {}]  }
   0x1   :  { %s36_s8 = smov 0  }
   0x2   :  { %18 = dma.general %s53_s0, 128, %s54_s1, %s34_s6, %s35_s7, [#allocation4], %s36_s8, 0  }
   0x3   :  { %32 = dma.done.wait [#allocation2], 128 }
   0x4   :  { %33 = vsyncadd [#allocation2], 4294967168 }
   0x5   :  { %22 = vsyncmov [#allocation2] }
   0x8   :  { %s23_s13 = vpop.sfrf %22 }
   0x9   :  { %p28_p0 = scmp.ne.s32.totalorder %s23_s13, 0 }
   0xb   :  { %27 = shalt.err (%p28_p0)  }

</bundles_post_ra>
